<compile_context>
chip_gen: v6e
topology: v6e:2x2x1
jax: 0.10.0
libtpu: 0.0.40
codegen_flags: <defaults>
</compile_context>

<pallas_src>
import jax
import jax.numpy as jnp
from jax.experimental import pallas as pl
from jax.experimental.pallas import tpu as pltpu


def conv1x1_kernel(w_ref, x_ref, o_ref):
    # w_ref: (Cout, Cin) f32   x_ref: (Cin, M) f32   o_ref: (Cout, M) f32
    o_ref[...] = jnp.dot(
        w_ref[...], x_ref[...], preferred_element_type=jnp.float32
    )


def conv1x1(x_nchw, w_mat):
    """x_nchw: [N, Cin, H, W] f32 ; w_mat: [Cout, Cin] f32 -> [N, Cout, H, W]."""
    N, Cin, H, W = x_nchw.shape
    Cout = w_mat.shape[0]
    M = H * W

    cost = pl.CostEstimate(
        flops=2 * N * M * Cin * Cout,
        transcendentals=0,
        bytes_accessed=4 * (N * Cin * M + Cout * Cin + N * Cout * M),
    )

    if N == 1:
        # Single grid-free invocation: no per-grid-step overhead at all.
        x2 = x_nchw.reshape(Cin, M)  # free reshape, no transpose
        out = pl.pallas_call(
            conv1x1_kernel,
            out_shape=jax.ShapeDtypeStruct((Cout, M), jnp.float32),
            in_specs=[
                pl.BlockSpec((Cout, Cin), lambda: (0, 0)),  # W resident in VMEM
                pl.BlockSpec((Cin, M), lambda: (0, 0)),     # X[Cin, M]
            ],
            out_specs=pl.BlockSpec((Cout, M), lambda: (0, 0)),
            cost_estimate=cost,
        )(w_mat, x2)
        return out.reshape(1, Cout, H, W)

    # General batch: one full-extent block per batch item, batch axis parallel
    # (splits across TensorCores on v7x when N >= 2).  Do NOT tile M / Cin
    # finer -- per-step overhead dominates at this problem size.
    x3 = x_nchw.reshape(N, Cin, M)
    out = pl.pallas_call(
        conv1x1_kernel,
        out_shape=jax.ShapeDtypeStruct((N, Cout, M), jnp.float32),
        grid=(N,),
        in_specs=[
            pl.BlockSpec((Cout, Cin), lambda n: (0, 0)),        # W stays resident
            pl.BlockSpec((None, Cin, M), lambda n: (n, 0, 0)),  # X_b[Cin, M]
        ],
        out_specs=pl.BlockSpec((None, Cout, M), lambda n: (n, 0, 0)),
        compiler_params=pltpu.CompilerParams(
            dimension_semantics=("parallel",),
        ),
        cost_estimate=cost,
    )(w_mat, x3)
    return out.reshape(N, Cout, H, W)


if __name__ == "__main__":
    key = jax.random.PRNGKey(0)
    kx, kw = jax.random.split(key)

    # Shapes implied by the module: input [1, 192, 25, 25], weight [64, 192, 1, 1]
    x = jax.random.normal(kx, (1, 192, 25, 25), dtype=jnp.float32)
    w = jax.random.normal(kw, (64, 192, 1, 1), dtype=jnp.float32) * 0.05

    # Weights are static: collapse the 1x1 kernel dims once, outside the hot path.
    w_mat = w.reshape(64, 192)

    out = conv1x1(x, w_mat)
    out = jax.block_until_ready(out)

    # Sanity check against a plain-JAX reference (1x1 conv == channel matmul).
    ref = jnp.einsum("nchw,oc->nohw", x, w_mat)
    assert out.shape == (1, 64, 25, 25)
    assert jnp.allclose(out, ref, atol=1e-4, rtol=1e-4)

    print("KERNEL_OK")
</pallas_src>

<mosaic_0001>
module attributes {stable_mosaic.version = 11 : i64} {
  func.func @conv1x1_kernel(%arg0: memref<64x192xf32, #tpu.memory_space<vmem>>, %arg1: memref<192x625xf32, #tpu.memory_space<vmem>>, %arg2: memref<64x625xf32, #tpu.memory_space<vmem>>) attributes {dimension_semantics = [], scalar_prefetch = 0 : i64, scratch_operands = 0 : i64, tpu.core_type = #tpu.core_type<tc>} {
    %c0 = arith.constant 0 : index
    %c0_0 = arith.constant 0 : index
    %0 = vector.load %arg0[%c0, %c0_0] : memref<64x192xf32, #tpu.memory_space<vmem>>, vector<64x192xf32>
    %c0_1 = arith.constant 0 : index
    %c0_2 = arith.constant 0 : index
    %1 = vector.load %arg1[%c0_1, %c0_2] : memref<192x625xf32, #tpu.memory_space<vmem>>, vector<192x625xf32>
    %cst = arith.constant dense<0.000000e+00> : vector<64x625xf32>
    %2 = tpu.matmul %0, %1, %cst {dimension_numbers = #tpu.dot_dimension_numbers<[1], [0], [0], [1], [0, 0, 1, 1], [], []>} : vector<64x192xf32>, vector<192x625xf32>, vector<64x625xf32> -> vector<64x625xf32>
    %c0_3 = arith.constant 0 : index
    %c0_4 = arith.constant 0 : index
    %3 = vector.load %arg2[%c0_3, %c0_4] : memref<64x625xf32, #tpu.memory_space<vmem>>, vector<64x625xf32>
    tpu.vector_store %arg2[%c0_3, %c0_4], %2 {strides = array<i32>} : memref<64x625xf32, #tpu.memory_space<vmem>>, vector<64x625xf32>,
    return
  }
}

</mosaic_0001>

<bundles_post_ra>
// kernel: tpu_custom_call.1
= control target key start
LH: loop header
LB: loop body
LE: loop exit
PB: predicated region body
PF: predicated region fallthrough
CT: control target
= control target key end

     0   :  { %7 = vsyncpa [#allocation3], 0  ;;  %s910_s0 = inlined_call_operand.hbm [shape: f32[64,192], index: 0, kind: input, shape index: {}]   ;;  %s911_s1 = inlined_call_operand.hbm [shape: f32[192,625], index: 1, kind: input, shape index: {}]   ;;  %s912_s2 = inlined_call_operand.hbm [shape: f32[64,625], index: 2, kind: output, shape index: {}]  }
   0x1   :  { %8 = vsyncpa [#allocation6], 0 }
   0x2   :  { %9 = vsyncpa [#allocation4], 0  ;;  %s737_s9 = smov [#allocation2]  }
   0x3   :  { %s15_s10 = sshll.u32 %s737_s9, 4  ;;  %s16_s10 = int_to_ptr.vmem [resolvable:$true] %s15_s10 }
   0x4   :  { %s679_s11 = scalar_lea.vmem %s16_s10, 2048  ;;  %p684_p1 = scmp.lt.s32.totalorder %s16_s10, %s16_s10 }
   0x5   :  { %p680_p0 = scmp.ne.s32.totalorder %s16_s10, %s679_s11  ;;  %p685_p2 = scmp.lt.s32.totalorder %s679_s11, %s679_s11 }
   0x7   :  { %p686_p3 = por %p685_p2, %p684_p1 }
   0x9   :  { %p687_p4 = pnand %p686_p3, %p680_p0 }
   0xb   :  { %690 = shalt.err (!%p687_p4)
}
   0xc   :  { %s738_s12 = smov 256   ;;  %s739_s13 = smov 16  }
   0xd   :  { %21 = dma.hbm_to_vmem [thread:$0]  %s910_s0, 2048, %s16_s10, [#allocation3], %s738_s12, %s738_s12, %s739_s13  }
   0xe   :  { %s740_s16 = smov [#allocation5]  }
   0xf   :  { %s27_s17 = sshll.u32 %s740_s16, 4  ;;  %s28_s17 = int_to_ptr.vmem [resolvable:$true] %s27_s17 }
  0x10   :  { %s699_s18 = scalar_lea.vmem %s28_s17, 15360  ;;  %p704_p6 = scmp.lt.s32.totalorder %s28_s17, %s28_s17 }
  0x11   :  { %p700_p5 = scmp.ne.s32.totalorder %s28_s17, %s699_s18  ;;  %p705_p7 = scmp.lt.s32.totalorder %s699_s18, %s699_s18 }
  0x13   :  { %p706_p8 = por %p705_p7, %p704_p6 }
  0x15   :  { %p707_p9 = pnand %p706_p8, %p700_p5 }
  0x17   :  { %710 = shalt.err (!%p707_p9)
}
  0x18   :  { %s741_s19 = smov 640   ;;  %s742_s20 = smov 40  }
  0x19   :  { %33 = dma.hbm_to_vmem [thread:$0]  %s911_s1, 15360, %s28_s17, [#allocation6], %s741_s19, %s741_s19, %s742_s20  }
  0x1a   :  { %731 = dma.done.wait [#allocation3], 2048  }
  0x1b   :  { %732 = vsyncadd [#allocation3], 4294965248 }
  0x1c   :  { %733 = dma.done.wait [#allocation6], 15360  }
  0x1d   :  { %734 = vsyncadd [#allocation6], 4294951936  ;;  %v132_v0 = vld [vmem:[#allocation5 + $0x260] sm:$0xff]  ;;  %v134_v1 = vld [vmem:[#allocation5 + $0x270] sm:$0xff]  ;;  %vm176_vm0 = vcmask 523264   ;;  %vm536_vm1 = vcmask 924672  }
  0x1e   :  { %v131_v2 = vld [vmem:[#allocation5 + $0x258] sm:$0xff]  ;;  %201 = vmatprep.subr.mxu0 %v132_v0  ;;  %314 = vmatprep.subr.mxu1 %v134_v1  ;;  %v133_v3 = vld [vmem:[#allocation5 + $0x268] sm:$0xff]  ;;  %v126_v6 = vld [vmem:[#allocation5 + $0x230] sm:$0xff]  ;;  %s744_s0 = smov [#allocation7]  }
  0x1f   :  { %v127_v4 = vld [vmem:[#allocation5 + $0x238] sm:$0xff]  ;;  %v129_v5 = vld [vmem:[#allocation5 + $0x248] sm:$0xff]  ;;  %202 = vmatpush1.msra.mxu0 %v131_v2  ;;  %315 = vmatpush1.msra.mxu1 %v133_v3  ;;  %v128_v7 = vld [vmem:[#allocation5 + $0x240] sm:$0xff]  ;;  %s578_s1 = sshll.u32 %s744_s0, 4  ;;  %s579_s1 = int_to_ptr.vmem [resolvable:$true] %s578_s1 }
  0x20   :  { %v122_v8 = vld [vmem:[#allocation5 + $0x210] sm:$0xff]  ;;  %203 = vmatprep.subr.mxu0 %v127_v4  ;;  %316 = vmatprep.subr.mxu1 %v129_v5  ;;  %v124_v9 = vld [vmem:[#allocation5 + $0x220] sm:$0xff]  ;;  %v121_v10 = vld [vmem:[#allocation5 + $0x208] sm:$0xff]  ;;  %s711_s23 = scalar_lea.vmem %s579_s1, 5120  ;;  %p716_p11 = scmp.lt.s32.totalorder %s579_s1, %s579_s1 }
  0x21   :  { %v123_v11 = vld [vmem:[#allocation5 + $0x218] sm:$0xff]  ;;  %204 = vmatpush1.msra.mxu0 %v126_v6  ;;  %317 = vmatpush1.msra.mxu1 %v128_v7  ;;  %v117_v12 = vld [vmem:[#allocation5 + $0x1e8] sm:$0xff]  ;;  %v116_v14 = vld [vmem:[#allocation5 + $0x1e0] sm:$0xff]  ;;  %p712_p10 = scmp.ne.s32.totalorder %s579_s1, %s711_s23  ;;  %p717_p12 = scmp.lt.s32.totalorder %s711_s23, %s711_s23 }
  0x22   :  { %v119_v13 = vld [vmem:[#allocation5 + $0x1f8] sm:$0xff]  ;;  %205 = vmatprep.subr.mxu0 %v122_v8  ;;  %318 = vmatprep.subr.mxu1 %v124_v9  ;;  %v118_v15 = vld [vmem:[#allocation5 + $0x1f0] sm:$0xff]  ;;  %v112_v16 = vld [vmem:[#allocation5 + $0x1c0] sm:$0xff] }
  0x23   :  { %206 = vmatpush1.msra.mxu0 %v121_v10  ;;  %319 = vmatpush1.msra.mxu1 %v123_v11  ;;  %v114_v17 = vld [vmem:[#allocation5 + $0x1d0] sm:$0xff]  ;;  %v111_v18 = vld [vmem:[#allocation5 + $0x1b8] sm:$0xff]  ;;  %v113_v19 = vld [vmem:[#allocation5 + $0x1c8] sm:$0xff]  ;;  %p718_p13 = por %p717_p12, %p716_p11 }
  0x24   :  { %207 = vmatprep.subr.mxu0 %v117_v12  ;;  %320 = vmatprep.subr.mxu1 %v119_v13  ;;  %v107_v20 = vld [vmem:[#allocation5 + $0x198] sm:$0xff]  ;;  %v109_v21 = vld [vmem:[#allocation5 + $0x1a8] sm:$0xff]  ;;  %v106_v22 = vld [vmem:[#allocation5 + $0x190] sm:$0xff] }
  0x25   :  { %208 = vmatpush1.msra.mxu0 %v116_v14  ;;  %321 = vmatpush1.msra.mxu1 %v118_v15  ;;  %v108_v23 = vld [vmem:[#allocation5 + $0x1a0] sm:$0xff]  ;;  %v102_v24 = vld [vmem:[#allocation5 + $0x170] sm:$0xff]  ;;  %v101_v26 = vld [vmem:[#allocation5 + $0x168] sm:$0xff]  ;;  %p719_p0 = pnand %p718_p13, %p712_p10 }
  0x26   :  { %209 = vmatprep.subr.mxu0 %v112_v16  ;;  %322 = vmatprep.subr.mxu1 %v114_v17  ;;  %v104_v25 = vld [vmem:[#allocation5 + $0x180] sm:$0xff]  ;;  %v103_v27 = vld [vmem:[#allocation5 + $0x178] sm:$0xff]  ;;  %v97_v28 = vld [vmem:[#allocation5 + $0x148] sm:$0xff] }
  0x27   :  { %210 = vmatpush1.msra.mxu0 %v111_v18  ;;  %323 = vmatpush1.msra.mxu1 %v113_v19  ;;  %v99_v29 = vld [vmem:[#allocation5 + $0x158] sm:$0xff]  ;;  %v96_v30 = vld [vmem:[#allocation5 + $0x140] sm:$0xff]  ;;  %v98_v31 = vld [vmem:[#allocation5 + $0x150] sm:$0xff] }
  0x28   :  { %211 = vmatprep.subr.mxu0 %v107_v20  ;;  %324 = vmatprep.subr.mxu1 %v109_v21  ;;  %v92_v32 = vld [vmem:[#allocation5 + $0x120] sm:$0xff]  ;;  %v94_v33 = vld [vmem:[#allocation5 + $0x130] sm:$0xff]  ;;  %v91_v34 = vld [vmem:[#allocation5 + $0x118] sm:$0xff] }
  0x29   :  { %212 = vmatpush1.msra.mxu0 %v106_v22  ;;  %325 = vmatpush1.msra.mxu1 %v108_v23  ;;  %v93_v35 = vld [vmem:[#allocation5 + $0x128] sm:$0xff]  ;;  %v87_v36 = vld [vmem:[#allocation5 + $0xf8] sm:$0xff]  ;;  %v86_v38 = vld [vmem:[#allocation5 + $0xf0] sm:$0xff] }
  0x2a   :  { %213 = vmatprep.subr.mxu0 %v102_v24  ;;  %326 = vmatprep.subr.mxu1 %v104_v25  ;;  %v89_v37 = vld [vmem:[#allocation5 + $0x108] sm:$0xff]  ;;  %v88_v39 = vld [vmem:[#allocation5 + $0x100] sm:$0xff]  ;;  %v82_v40 = vld [vmem:[#allocation5 + $0xd0] sm:$0xff] }
  0x2b   :  { %214 = vmatpush1.msra.mxu0 %v101_v26  ;;  %327 = vmatpush1.msra.mxu1 %v103_v27  ;;  %v84_v41 = vld [vmem:[#allocation5 + $0xe0] sm:$0xff]  ;;  %v81_v42 = vld [vmem:[#allocation5 + $0xc8] sm:$0xff]  ;;  %v83_v43 = vld [vmem:[#allocation5 + $0xd8] sm:$0xff] }
  0x2c   :  { %215 = vmatprep.subr.mxu0 %v97_v28  ;;  %328 = vmatprep.subr.mxu1 %v99_v29  ;;  %v77_v44 = vld [vmem:[#allocation5 + $0xa8] sm:$0xff]  ;;  %v79_v45 = vld [vmem:[#allocation5 + $0xb8] sm:$0xff]  ;;  %v76_v46 = vld [vmem:[#allocation5 + $0xa0] sm:$0xff] }
  0x2d   :  { %216 = vmatpush1.msra.mxu0 %v96_v30  ;;  %329 = vmatpush1.msra.mxu1 %v98_v31  ;;  %v78_v47 = vld [vmem:[#allocation5 + $0xb0] sm:$0xff]  ;;  %v72_v48 = vld [vmem:[#allocation5 + $0x80] sm:$0xff]  ;;  %v71_v50 = vld [vmem:[#allocation5 + $0x78] sm:$0xff] }
  0x2e   :  { %217 = vmatprep.subr.mxu0 %v92_v32  ;;  %330 = vmatprep.subr.mxu1 %v94_v33  ;;  %v74_v49 = vld [vmem:[#allocation5 + $0x90] sm:$0xff]  ;;  %v73_v51 = vld [vmem:[#allocation5 + $0x88] sm:$0xff]  ;;  %v67_v52 = vld [vmem:[#allocation5 + $0x58] sm:$0xff] }
  0x2f   :  { %218 = vmatpush1.msra.mxu0 %v91_v34  ;;  %331 = vmatpush1.msra.mxu1 %v93_v35  ;;  %v69_v53 = vld [vmem:[#allocation5 + $0x68] sm:$0xff]  ;;  %v66_v54 = vld [vmem:[#allocation5 + $0x50] sm:$0xff]  ;;  %v68_v55 = vld [vmem:[#allocation5 + $0x60] sm:$0xff]  ;;  %v743_v35 = vmov 0.0  }
  0x30   :  { %219 = vmatprep.subr.mxu0 %v87_v36  ;;  %332 = vmatprep.subr.mxu1 %v89_v37  ;;  %v62_v56 = vld [vmem:[#allocation5 + $0x30] sm:$0xff]  ;;  %v64_v57 = vld [vmem:[#allocation5 + $0x40] sm:$0xff]  ;;  %v61_v58 = vld [vmem:[#allocation5 + $0x28] sm:$0xff] }
  0x31   :  { %220 = vmatpush1.msra.mxu0 %v86_v38  ;;  %333 = vmatpush1.msra.mxu1 %v88_v39  ;;  %v63_v59 = vld [vmem:[#allocation5 + $0x38] sm:$0xff]  ;;  %v57_v60 = vld [vmem:[#allocation5 + $0x8] sm:$0xff]  ;;  %v56_v62 = vld [vmem:[#allocation5] sm:$0xff] }
  0x32   :  { %221 = vmatprep.subr.mxu0 %v82_v40  ;;  %334 = vmatprep.subr.mxu1 %v84_v41  ;;  %v59_v61 = vld [vmem:[#allocation5 + $0x18] sm:$0xff]  ;;  %v58_v63 = vld [vmem:[#allocation5 + $0x10] sm:$0xff]  ;;  %v172_v0 = vld [vmem:[#allocation5 + $0x3a0] sm:$0xff] }
  0x33   :  { %222 = vmatpush1.msra.mxu0 %v81_v42  ;;  %335 = vmatpush1.msra.mxu1 %v83_v43  ;;  %v174_v1 = vld [vmem:[#allocation5 + $0x3b0] sm:$0xff]  ;;  %v171_v2 = vld [vmem:[#allocation5 + $0x398] sm:$0xff]  ;;  %v173_v3 = vld [vmem:[#allocation5 + $0x3a8] sm:$0xff] }
  0x34   :  { %223 = vmatprep.subr.mxu0 %v77_v44  ;;  %336 = vmatprep.subr.mxu1 %v79_v45  ;;  %v167_v4 = vld [vmem:[#allocation5 + $0x378] sm:$0xff]  ;;  %v169_v5 = vld [vmem:[#allocation5 + $0x388] sm:$0xff]  ;;  %v166_v6 = vld [vmem:[#allocation5 + $0x370] sm:$0xff] }
  0x35   :  { %224 = vmatpush1.msra.mxu0 %v76_v46  ;;  %337 = vmatpush1.msra.mxu1 %v78_v47  ;;  %v168_v7 = vld [vmem:[#allocation5 + $0x380] sm:$0xff]  ;;  %v162_v8 = vld [vmem:[#allocation5 + $0x350] sm:$0xff]  ;;  %v161_v10 = vld [vmem:[#allocation5 + $0x348] sm:$0xff] }
  0x36   :  { %225 = vmatprep.subr.mxu0 %v72_v48  ;;  %338 = vmatprep.subr.mxu1 %v74_v49  ;;  %v164_v9 = vld [vmem:[#allocation5 + $0x360] sm:$0xff]  ;;  %v163_v11 = vld [vmem:[#allocation5 + $0x358] sm:$0xff]  ;;  %v157_v12 = vld [vmem:[#allocation5 + $0x328] sm:$0xff] }
  0x37   :  { %226 = vmatpush1.msra.mxu0 %v71_v50  ;;  %339 = vmatpush1.msra.mxu1 %v73_v51  ;;  %v159_v13 = vld [vmem:[#allocation5 + $0x338] sm:$0xff]  ;;  %v156_v14 = vld [vmem:[#allocation5 + $0x320] sm:$0xff]  ;;  %v158_v15 = vld [vmem:[#allocation5 + $0x330] sm:$0xff] }
  0x38   :  { %227 = vmatprep.subr.mxu0 %v67_v52  ;;  %340 = vmatprep.subr.mxu1 %v69_v53  ;;  %v152_v16 = vld [vmem:[#allocation5 + $0x300] sm:$0xff]  ;;  %v154_v17 = vld [vmem:[#allocation5 + $0x310] sm:$0xff]  ;;  %v151_v18 = vld [vmem:[#allocation5 + $0x2f8] sm:$0xff] }
  0x39   :  { %228 = vmatpush1.msra.mxu0 %v66_v54  ;;  %341 = vmatpush1.msra.mxu1 %v68_v55  ;;  %v153_v19 = vld [vmem:[#allocation5 + $0x308] sm:$0xff]  ;;  %v147_v20 = vld [vmem:[#allocation5 + $0x2d8] sm:$0xff]  ;;  %v146_v22 = vld [vmem:[#allocation5 + $0x2d0] sm:$0xff] }
  0x3a   :  { %229 = vmatprep.subr.mxu0 %v62_v56  ;;  %342 = vmatprep.subr.mxu1 %v64_v57  ;;  %v149_v21 = vld [vmem:[#allocation5 + $0x2e8] sm:$0xff]  ;;  %v148_v23 = vld [vmem:[#allocation5 + $0x2e0] sm:$0xff]  ;;  %v142_v24 = vld [vmem:[#allocation5 + $0x2b0] sm:$0xff] }
  0x3b   :  { %230 = vmatpush1.msra.mxu0 %v61_v58  ;;  %343 = vmatpush1.msra.mxu1 %v63_v59  ;;  %v144_v25 = vld [vmem:[#allocation5 + $0x2c0] sm:$0xff]  ;;  %v141_v26 = vld [vmem:[#allocation5 + $0x2a8] sm:$0xff]  ;;  %v143_v27 = vld [vmem:[#allocation5 + $0x2b8] sm:$0xff] }
  0x3c   :  { %231 = vmatprep.subr.mxu0 %v57_v60  ;;  %344 = vmatprep.subr.mxu1 %v59_v61  ;;  %v137_v28 = vld [vmem:[#allocation5 + $0x288] sm:$0xff]  ;;  %v139_v29 = vld [vmem:[#allocation5 + $0x298] sm:$0xff]  ;;  %v136_v30 = vld [vmem:[#allocation5 + $0x280] sm:$0xff] }
  0x3d   :  { %232 = vmatpush1.msra.mxu0 %v56_v62  ;;  %345 = vmatpush1.msra.mxu1 %v58_v63  ;;  %v769_v31 = vld [vmem:[#allocation2 + $0x8] sm:$0xff]  ;;  %v138_v32 = vld [vmem:[#allocation5 + $0x290] sm:$0xff]  ;;  %v771_v33 = vld [vmem:[#allocation2] sm:$0xff] }
  0x3e   :  { %249 = vmatprep.subr.mxu0 %v172_v0  ;;  %362 = vmatprep.subr.mxu1 %v174_v1  ;;  %v135_v34 = vld [vmem:[#allocation5 + $0x278] sm:$0xff]  ;;  %v130_v36 = vld [vmem:[#allocation5 + $0x250] sm:$0xff]  ;;  %v125_v37 = vld [vmem:[#allocation5 + $0x228] sm:$0xff] }
  0x3f   :  { %250 = vmatpush2.msra.mxu0 %v171_v2  ;;  %363 = vmatpush2.msra.mxu1 %v173_v3  ;;  %v120_v38 = vld [vmem:[#allocation5 + $0x200] sm:$0xff]  ;;  %v115_v39 = vld [vmem:[#allocation5 + $0x1d8] sm:$0xff]  ;;  %v110_v40 = vld [vmem:[#allocation5 + $0x1b0] sm:$0xff] }
  0x40   :  { %251 = vmatprep.subr.mxu0 %v167_v4  ;;  %364 = vmatprep.subr.mxu1 %v169_v5  ;;  %v105_v41 = vld [vmem:[#allocation5 + $0x188] sm:$0xff]  ;;  %v100_v42 = vld [vmem:[#allocation5 + $0x160] sm:$0xff]  ;;  %v795_v43 = vld [vmem:[#allocation2 + $0x18] sm:$0xff] }
  0x41   :  { %252 = vmatpush2.msra.mxu0 %v166_v6  ;;  %365 = vmatpush2.msra.mxu1 %v168_v7  ;;  %v95_v44 = vld [vmem:[#allocation5 + $0x138] sm:$0xff]  ;;  %v799_v45 = vld [vmem:[#allocation2 + $0x10] sm:$0xff]  ;;  %v809_v47 = vld [vmem:[#allocation2 + $0x28] sm:$0xff] }
  0x42   :  { %253 = vmatprep.subr.mxu0 %v162_v8  ;;  %366 = vmatprep.subr.mxu1 %v164_v9  ;;  %v90_v46 = vld [vmem:[#allocation5 + $0x110] sm:$0xff]  ;;  %v85_v48 = vld [vmem:[#allocation5 + $0xe8] sm:$0xff]  ;;  %v813_v49 = vld [vmem:[#allocation2 + $0x20] sm:$0xff] }
  0x43   :  { %254 = vmatpush2.msra.mxu0 %v161_v10  ;;  %367 = vmatpush2.msra.mxu1 %v163_v11  ;;  %v80_v50 = vld [vmem:[#allocation5 + $0xc0] sm:$0xff]  ;;  %v823_v51 = vld [vmem:[#allocation2 + $0x38] sm:$0xff]  ;;  %v827_v53 = vld [vmem:[#allocation2 + $0x30] sm:$0xff] }
  0x44   :  { %255 = vmatprep.subr.mxu0 %v157_v12  ;;  %368 = vmatprep.subr.mxu1 %v159_v13  ;;  %v75_v52 = vld [vmem:[#allocation5 + $0x98] sm:$0xff]  ;;  %v70_v54 = vld [vmem:[#allocation5 + $0x70] sm:$0xff]  ;;  %v837_v55 = vld [vmem:[#allocation2 + $0x48] sm:$0xff] }
  0x45   :  { %256 = vmatpush2.msra.mxu0 %v156_v14  ;;  %369 = vmatpush2.msra.mxu1 %v158_v15  ;;  %v65_v56 = vld [vmem:[#allocation5 + $0x48] sm:$0xff]  ;;  %v841_v57 = vld [vmem:[#allocation2 + $0x40] sm:$0xff]  ;;  %v851_v59 = vld [vmem:[#allocation2 + $0x58] sm:$0xff] }
  0x46   :  { %257 = vmatprep.subr.mxu0 %v152_v16  ;;  %370 = vmatprep.subr.mxu1 %v154_v17  ;;  %v60_v58 = vld [vmem:[#allocation5 + $0x20] sm:$0xff]  ;;  %v175_v60 = vld [vmem:[#allocation5 + $0x3b8] sm:$0xff]  ;;  %v50_v61 = vld [vmem:[#allocation2 + $0x50] sm:$0xff] }
  0x47   :  { %258 = vmatpush2.msra.mxu0 %v151_v18  ;;  %371 = vmatpush2.msra.mxu1 %v153_v19  ;;  %v170_v62 = vld [vmem:[#allocation5 + $0x390] sm:$0xff]  ;;  %v53_v63 = vld [vmem:[#allocation2 + $0x68] sm:$0xff]  ;;  %v52_v1 = vld [vmem:[#allocation2 + $0x60] sm:$0xff] }
  0x48   :  { %259 = vmatprep.subr.mxu0 %v147_v20  ;;  %372 = vmatprep.subr.mxu1 %v149_v21  ;;  %v165_v0 = vld [vmem:[#allocation5 + $0x368] sm:$0xff]  ;;  %v160_v2 = vld [vmem:[#allocation5 + $0x340] sm:$0xff]  ;;  %v55_v3 = vld [vmem:[#allocation2 + $0x78] sm:$0xff] }
  0x49   :  { %260 = vmatpush2.msra.mxu0 %v146_v22  ;;  %373 = vmatpush2.msra.mxu1 %v148_v23  ;;  %v155_v4 = vld [vmem:[#allocation5 + $0x318] sm:$0xff]  ;;  %v54_v5 = vld [vmem:[#allocation2 + $0x70] sm:$0xff]  ;;  %v145_v7 = vld [vmem:[#allocation5 + $0x2c8] sm:$0xff] }
  0x4a   :  { %261 = vmatprep.subr.mxu0 %v142_v24  ;;  %374 = vmatprep.subr.mxu1 %v144_v25  ;;  %v150_v6 = vld [vmem:[#allocation5 + $0x2f0] sm:$0xff]  ;;  %v140_v8 = vld [vmem:[#allocation5 + $0x2a0] sm:$0xff] }
  0x4b   :  { %262 = vmatpush2.msra.mxu0 %v141_v26  ;;  %375 = vmatpush2.msra.mxu1 %v143_v27 }
  0x4c   :  { %263 = vmatprep.subr.mxu0 %v137_v28  ;;  %376 = vmatprep.subr.mxu1 %v139_v29 }
  0x4d   :  { %264 = vmatpush2.msra.mxu0 %v136_v30  ;;  %591 = vmatprep.mubr.msk.f32.mxu0 %vm176_vm0, %v769_v31 }
  0x4e   :  { %377 = vmatpush2.msra.mxu1 %v138_v32  ;;  %599 = vmatprep.mubr.msk.f32.mxu1 %vm176_vm0, %v769_v31 }
  0x4f   :  { %266 = vmatmul.mubr.f32.vlgmr.msra.gmra.mxu0 %v771_v33  ;;  %379 = vmatmul.mubr.f32.vlgmr.msra.gmra.mxu1 %v771_v33 }
  0x50   :  { %427 = vmatprep.subr.mxu0 %v743_v35  ;;  %615 = vmatprep.subr.mxu1 %v743_v35 }
  0x51   :  { %428 = vmatpush1.msra.mxu0 %v135_v34  ;;  %639 = vmatpush1.msra.mxu1 %v135_v34 }
  0x52   :  { %429 = vmatprep.subr.mxu0 %v743_v35  ;;  %616 = vmatprep.subr.mxu1 %v743_v35 }
  0x53   :  { %430 = vmatpush1.msra.mxu0 %v130_v36  ;;  %640 = vmatpush1.msra.mxu1 %v130_v36 }
  0x54   :  { %431 = vmatprep.subr.mxu0 %v743_v35  ;;  %617 = vmatprep.subr.mxu1 %v743_v35 }
  0x55   :  { %432 = vmatpush1.msra.mxu0 %v125_v37  ;;  %641 = vmatpush1.msra.mxu1 %v125_v37 }
  0x56   :  { %433 = vmatprep.subr.mxu0 %v743_v35  ;;  %618 = vmatprep.subr.mxu1 %v743_v35 }
  0x57   :  { %434 = vmatpush1.msra.mxu0 %v120_v38  ;;  %642 = vmatpush1.msra.mxu1 %v120_v38 }
  0x58   :  { %435 = vmatprep.subr.mxu0 %v743_v35  ;;  %619 = vmatprep.subr.mxu1 %v743_v35 }
  0x59   :  { %436 = vmatpush1.msra.mxu0 %v115_v39  ;;  %643 = vmatpush1.msra.mxu1 %v115_v39 }
  0x5a   :  { %437 = vmatprep.subr.mxu0 %v743_v35  ;;  %620 = vmatprep.subr.mxu1 %v743_v35 }
  0x5b   :  { %438 = vmatpush1.msra.mxu0 %v110_v40  ;;  %644 = vmatpush1.msra.mxu1 %v110_v40 }
  0x5c   :  { %439 = vmatprep.subr.mxu0 %v743_v35  ;;  %621 = vmatprep.subr.mxu1 %v743_v35 }
  0x5d   :  { %440 = vmatpush1.msra.mxu0 %v105_v41  ;;  %645 = vmatpush1.msra.mxu1 %v105_v41 }
  0x5e   :  { %441 = vmatprep.subr.mxu0 %v743_v35  ;;  %622 = vmatprep.subr.mxu1 %v743_v35 }
  0x5f   :  { %442 = vmatpush1.msra.mxu0 %v100_v42  ;;  %646 = vmatpush1.msra.mxu1 %v100_v42 }
  0x60   :  { %443 = vmatprep.subr.mxu0 %v743_v35  ;;  %623 = vmatprep.subr.mxu1 %v743_v35 }
  0x61   :  { %592 = vmatprep.mubr.msk.f32.mxu0 %vm176_vm0, %v795_v43  ;;  %600 = vmatprep.mubr.msk.f32.mxu1 %vm176_vm0, %v795_v43 }
  0x62   :  { %444 = vmatpush1.msra.mxu0 %v95_v44  ;;  %647 = vmatpush1.msra.mxu1 %v95_v44 }
  0x63   :  { %272 = vmatmul.mubr.f32.gmra.mxu0 %v799_v45  ;;  %385 = vmatmul.mubr.f32.gmra.mxu1 %v799_v45 }
  0x64   :  { %445 = vmatprep.subr.mxu0 %v743_v35  ;;  %624 = vmatprep.subr.mxu1 %v743_v35 }
  0x65   :  { %446 = vmatpush1.msra.mxu0 %v90_v46  ;;  %648 = vmatpush1.msra.mxu1 %v90_v46 }
  0x66   :  { %447 = vmatprep.subr.mxu0 %v743_v35  ;;  %625 = vmatprep.subr.mxu1 %v743_v35 }
  0x67   :  { %593 = vmatprep.mubr.msk.f32.mxu0 %vm176_vm0, %v809_v47  ;;  %601 = vmatprep.mubr.msk.f32.mxu1 %vm176_vm0, %v809_v47 }
  0x68   :  { %448 = vmatpush1.msra.mxu0 %v85_v48  ;;  %649 = vmatpush1.msra.mxu1 %v85_v48 }
  0x69   :  { %278 = vmatmul.mubr.f32.gmra.mxu0 %v813_v49  ;;  %391 = vmatmul.mubr.f32.gmra.mxu1 %v813_v49 }
  0x6a   :  { %449 = vmatprep.subr.mxu0 %v743_v35  ;;  %626 = vmatprep.subr.mxu1 %v743_v35 }
  0x6b   :  { %450 = vmatpush1.msra.mxu0 %v80_v50  ;;  %650 = vmatpush1.msra.mxu1 %v80_v50 }
  0x6c   :  { %451 = vmatprep.subr.mxu0 %v743_v35  ;;  %627 = vmatprep.subr.mxu1 %v743_v35 }
  0x6d   :  { %594 = vmatprep.mubr.msk.f32.mxu0 %vm176_vm0, %v823_v51  ;;  %602 = vmatprep.mubr.msk.f32.mxu1 %vm176_vm0, %v823_v51 }
  0x6e   :  { %452 = vmatpush1.msra.mxu0 %v75_v52  ;;  %651 = vmatpush1.msra.mxu1 %v75_v52 }
  0x6f   :  { %284 = vmatmul.mubr.f32.gmra.mxu0 %v827_v53  ;;  %397 = vmatmul.mubr.f32.gmra.mxu1 %v827_v53 }
  0x70   :  { %453 = vmatprep.subr.mxu0 %v743_v35  ;;  %628 = vmatprep.subr.mxu1 %v743_v35 }
  0x71   :  { %454 = vmatpush1.msra.mxu0 %v70_v54  ;;  %652 = vmatpush1.msra.mxu1 %v70_v54 }
  0x72   :  { %455 = vmatprep.subr.mxu0 %v743_v35  ;;  %629 = vmatprep.subr.mxu1 %v743_v35 }
  0x73   :  { %595 = vmatprep.mubr.msk.f32.mxu0 %vm176_vm0, %v837_v55  ;;  %603 = vmatprep.mubr.msk.f32.mxu1 %vm176_vm0, %v837_v55 }
  0x74   :  { %456 = vmatpush1.msra.mxu0 %v65_v56  ;;  %653 = vmatpush1.msra.mxu1 %v65_v56 }
  0x75   :  { %290 = vmatmul.mubr.f32.gmra.mxu0 %v841_v57  ;;  %403 = vmatmul.mubr.f32.gmra.mxu1 %v841_v57 }
  0x76   :  { %457 = vmatprep.subr.mxu0 %v743_v35  ;;  %630 = vmatprep.subr.mxu1 %v743_v35 }
  0x77   :  { %458 = vmatpush1.msra.mxu0 %v60_v58  ;;  %654 = vmatpush1.msra.mxu1 %v60_v58 }
  0x78   :  { %475 = vmatprep.subr.mxu0 %v743_v35  ;;  %631 = vmatprep.subr.mxu1 %v743_v35 }
  0x79   :  { %596 = vmatprep.mubr.msk.f32.mxu0 %vm176_vm0, %v851_v59  ;;  %604 = vmatprep.mubr.msk.f32.mxu1 %vm176_vm0, %v851_v59 }
  0x7a   :  { %476 = vmatpush2.msra.mxu0 %v175_v60  ;;  %655 = vmatpush2.msra.mxu1 %v175_v60 }
  0x7b   :  { %296 = vmatmul.mubr.f32.gmra.mxu0 %v50_v61  ;;  %409 = vmatmul.mubr.f32.gmra.mxu1 %v50_v61 }
  0x7c   :  { %477 = vmatprep.subr.mxu0 %v743_v35  ;;  %632 = vmatprep.subr.mxu1 %v743_v35 }
  0x7d   :  { %478 = vmatpush2.msra.mxu0 %v170_v62  ;;  %656 = vmatpush2.msra.mxu1 %v170_v62 }
  0x7e   :  { %479 = vmatprep.subr.mxu0 %v743_v35  ;;  %633 = vmatprep.subr.mxu1 %v743_v35 }
  0x7f   :  { %597 = vmatprep.mubr.msk.f32.mxu0 %vm176_vm0, %v53_v63  ;;  %605 = vmatprep.mubr.msk.f32.mxu1 %vm176_vm0, %v53_v63 }
  0x80   :  { %480 = vmatpush2.msra.mxu0 %v165_v0  ;;  %657 = vmatpush2.msra.mxu1 %v165_v0 }
  0x81   :  { %302 = vmatmul.mubr.f32.gmra.mxu0 %v52_v1  ;;  %415 = vmatmul.mubr.f32.gmra.mxu1 %v52_v1 }
  0x82   :  { %481 = vmatprep.subr.mxu0 %v743_v35  ;;  %634 = vmatprep.subr.mxu1 %v743_v35 }
  0x83   :  { %482 = vmatpush2.msra.mxu0 %v160_v2  ;;  %658 = vmatpush2.msra.mxu1 %v160_v2 }
  0x84   :  { %483 = vmatprep.subr.mxu0 %v743_v35  ;;  %635 = vmatprep.subr.mxu1 %v743_v35 }
  0x85   :  { %598 = vmatprep.mubr.msk.f32.mxu0 %vm176_vm0, %v55_v3  ;;  %606 = vmatprep.mubr.msk.f32.mxu1 %vm176_vm0, %v55_v3 }
  0x86   :  { %484 = vmatpush2.msra.mxu0 %v155_v4  ;;  %659 = vmatpush2.msra.mxu1 %v155_v4 }
  0x87   :  { %308 = vmatmul.mubr.f32.gmra.mxu0 %v54_v5  ;;  %421 = vmatmul.mubr.f32.gmra.mxu1 %v54_v5 }
  0x88   :  { %485 = vmatprep.subr.mxu0 %v743_v35  ;;  %636 = vmatprep.subr.mxu1 %v743_v35 }
  0x89   :  { %486 = vmatpush2.msra.mxu0 %v150_v6  ;;  %660 = vmatpush2.msra.mxu1 %v150_v6 }
  0x8a   :  { %487 = vmatprep.subr.mxu0 %v743_v35  ;;  %637 = vmatprep.subr.mxu1 %v743_v35 }
  0x8b   :  { %488 = vmatpush2.msra.mxu0 %v145_v7  ;;  %661 = vmatpush2.msra.mxu1 %v145_v7 }
  0x8c   :  { %489 = vmatprep.subr.mxu0 %v743_v35  ;;  %638 = vmatprep.subr.mxu1 %v743_v35 }
  0x8d   :  { %490 = vmatpush2.msra.mxu0 %v140_v8  ;;  %662 = vmatpush2.msra.mxu1 %v140_v8 }
  0x8e   :  { %607 = vmatprep.mubr.msk.f32.mxu0 %vm176_vm0, %v769_v31  ;;  %611 = vmatprep.mubr.msk.f32.mxu1 %vm176_vm0, %v837_v55 }
  0x8f   :  { %492 = vmatmul.mubr.f32.vlgmr.msra.gmra.mxu0 %v771_v33  ;;  %512 = vmatmul.mubr.f32.vlgmr.msra.gmra.mxu1 %v841_v57 }
  0x90   :  { %608 = vmatprep.mubr.msk.f32.mxu0 %vm176_vm0, %v795_v43  ;;  %612 = vmatprep.mubr.msk.f32.mxu1 %vm176_vm0, %v851_v59 }
  0x93   :  { %497 = vmatmul.mubr.f32.gmra.mxu0 %v799_v45  ;;  %517 = vmatmul.mubr.f32.gmra.mxu1 %v50_v61 }
  0x94   :  { %609 = vmatprep.mubr.msk.f32.mxu0 %vm176_vm0, %v809_v47  ;;  %613 = vmatprep.mubr.msk.f32.mxu1 %vm176_vm0, %v53_v63 }
  0x97   :  { %502 = vmatmul.mubr.f32.gmra.mxu0 %v813_v49  ;;  %522 = vmatmul.mubr.f32.gmra.mxu1 %v52_v1 }
  0x98   :  { %610 = vmatprep.mubr.msk.f32.mxu0 %vm176_vm0, %v823_v51  ;;  %614 = vmatprep.mubr.msk.f32.mxu1 %vm176_vm0, %v55_v3 }
  0x9b   :  { %507 = vmatmul.mubr.f32.gmra.mxu0 %v827_v53  ;;  %527 = vmatmul.mubr.f32.gmra.mxu1 %v54_v5 }
 0x10f   :  { %v267_v9 = vpop.f32.mrf.mxu0  ;;  %v380_v10 = vpop.f32.mrf.mxu1 }
 0x110   :  { %532 = vst [vmem:[#allocation7] sm:$0xff] %v267_v9  ;;  %534 = vst [vmem:[#allocation7 + $0x10] sm:$0xff] %v380_v10 }
 0x111   :  { %v269_v11 = vpop.f32.mrf.mxu0  ;;  %v382_v12 = vpop.f32.mrf.mxu1 }
 0x112   :  { %533 = vst [vmem:[#allocation7 + $0x8] sm:$0xff] %v269_v11  ;;  %535 = vst [vmem:[#allocation7 + $0x18] sm:$0xff] %v382_v12 }
 0x123   :  { %v273_v13 = vpop.f32.mrf.mxu0  ;;  %v386_v14 = vpop.f32.mrf.mxu1 }
 0x124   :  { %538 = vst [vmem:[#allocation7 + $0x28] sm:$0xff] %v273_v13  ;;  %540 = vst [vmem:[#allocation7 + $0x38] sm:$0xff] %v386_v14 }
 0x125   :  { %v275_v15 = vpop.f32.mrf.mxu0  ;;  %v388_v16 = vpop.f32.mrf.mxu1 }
 0x126   :  { %539 = vst [vmem:[#allocation7 + $0x30] sm:$0xff] %v275_v15  ;;  %541 = vst [vmem:[#allocation7 + $0x40] sm:$0xff] %v388_v16 }
 0x129   :  { %v279_v17 = vpop.f32.mrf.mxu0  ;;  %v392_v18 = vpop.f32.mrf.mxu1 }
 0x12a   :  { %543 = vst [vmem:[#allocation7 + $0x50] sm:$0xff] %v279_v17  ;;  %545 = vst [vmem:[#allocation7 + $0x60] sm:$0xff] %v392_v18 }
 0x12b   :  { %v281_v19 = vpop.f32.mrf.mxu0  ;;  %v394_v20 = vpop.f32.mrf.mxu1 }
 0x12c   :  { %544 = vst [vmem:[#allocation7 + $0x58] sm:$0xff] %v281_v19  ;;  %546 = vst [vmem:[#allocation7 + $0x68] sm:$0xff] %v394_v20 }
 0x12f   :  { %v285_v21 = vpop.f32.mrf.mxu0  ;;  %v398_v22 = vpop.f32.mrf.mxu1 }
 0x130   :  { %548 = vst [vmem:[#allocation7 + $0x78] sm:$0xff] %v285_v21  ;;  %550 = vst [vmem:[#allocation7 + $0x88] sm:$0xff] %v398_v22 }
 0x131   :  { %v287_v23 = vpop.f32.mrf.mxu0  ;;  %v400_v24 = vpop.f32.mrf.mxu1 }
 0x132   :  { %549 = vst [vmem:[#allocation7 + $0x80] sm:$0xff] %v287_v23  ;;  %551 = vst [vmem:[#allocation7 + $0x90] sm:$0xff] %v400_v24 }
 0x135   :  { %v291_v25 = vpop.f32.mrf.mxu0  ;;  %v404_v26 = vpop.f32.mrf.mxu1 }
 0x136   :  { %553 = vst [vmem:[#allocation7 + $0xa0] sm:$0xff] %v291_v25  ;;  %555 = vst [vmem:[#allocation7 + $0xb0] sm:$0xff] %v404_v26 }
 0x137   :  { %v293_v27 = vpop.f32.mrf.mxu0  ;;  %v406_v28 = vpop.f32.mrf.mxu1 }
 0x138   :  { %554 = vst [vmem:[#allocation7 + $0xa8] sm:$0xff] %v293_v27  ;;  %556 = vst [vmem:[#allocation7 + $0xb8] sm:$0xff] %v406_v28 }
 0x13b   :  { %v297_v29 = vpop.f32.mrf.mxu0  ;;  %v410_v30 = vpop.f32.mrf.mxu1 }
 0x13c   :  { %558 = vst [vmem:[#allocation7 + $0xc8] sm:$0xff] %v297_v29  ;;  %560 = vst [vmem:[#allocation7 + $0xd8] sm:$0xff] %v410_v30 }
 0x13d   :  { %v299_v31 = vpop.f32.mrf.mxu0  ;;  %v412_v32 = vpop.f32.mrf.mxu1 }
 0x13e   :  { %559 = vst [vmem:[#allocation7 + $0xd0] sm:$0xff] %v299_v31  ;;  %561 = vst [vmem:[#allocation7 + $0xe0] sm:$0xff] %v412_v32 }
 0x141   :  { %v303_v33 = vpop.f32.mrf.mxu0  ;;  %v416_v34 = vpop.f32.mrf.mxu1 }
 0x142   :  { %563 = vst [vmem:[#allocation7 + $0xf0] sm:$0xff] %v303_v33  ;;  %565 = vst [vmem:[#allocation7 + $0x100] sm:$0xff] %v416_v34 }
 0x143   :  { %v305_v35 = vpop.f32.mrf.mxu0  ;;  %v418_v36 = vpop.f32.mrf.mxu1 }
 0x144   :  { %564 = vst [vmem:[#allocation7 + $0xf8] sm:$0xff] %v305_v35  ;;  %566 = vst [vmem:[#allocation7 + $0x108] sm:$0xff] %v418_v36 }
 0x147   :  { %v309_v37 = vpop.f32.mrf.mxu0  ;;  %v422_v38 = vpop.f32.mrf.mxu1 }
 0x148   :  { %568 = vst [vmem:[#allocation7 + $0x118] sm:$0xff] %v309_v37  ;;  %570 = vst [vmem:[#allocation7 + $0x128] sm:$0xff] %v422_v38 }
 0x149   :  { %v311_v39 = vpop.f32.mrf.mxu0  ;;  %v424_v40 = vpop.f32.mrf.mxu1 }
 0x14a   :  { %569 = vst [vmem:[#allocation7 + $0x120] sm:$0xff] %v311_v39  ;;  %571 = vst [vmem:[#allocation7 + $0x130] sm:$0xff] %v424_v40 }
 0x14f   :  { %v493_v41 = vpop.f32.mrf.mxu0  ;;  %v513_v42 = vpop.f32.mrf.mxu1 }
 0x150   :  { %537 = vst.msk [vmem:[#allocation7 + $0x20] sm:$0xff] %vm536_vm1, %v493_v41  ;;  %557 = vst.msk [vmem:[#allocation7 + $0xc0] sm:$0xff] %vm536_vm1, %v513_v42 }
 0x151   :  { %v495_v43 = vpop.f32.mrf.mxu0  ;;  %v515_v44 = vpop.f32.mrf.mxu1 }
 0x153   :  { %v498_v45 = vpop.f32.mrf.mxu0  ;;  %v518_v46 = vpop.f32.mrf.mxu1 }
 0x154   :  { %542 = vst.msk [vmem:[#allocation7 + $0x48] sm:$0xff] %vm536_vm1, %v498_v45  ;;  %562 = vst.msk [vmem:[#allocation7 + $0xe8] sm:$0xff] %vm536_vm1, %v518_v46 }
 0x155   :  { %v500_v47 = vpop.f32.mrf.mxu0  ;;  %v520_v48 = vpop.f32.mrf.mxu1 }
 0x157   :  { %v503_v49 = vpop.f32.mrf.mxu0  ;;  %v523_v50 = vpop.f32.mrf.mxu1 }
 0x158   :  { %547 = vst.msk [vmem:[#allocation7 + $0x70] sm:$0xff] %vm536_vm1, %v503_v49  ;;  %567 = vst.msk [vmem:[#allocation7 + $0x110] sm:$0xff] %vm536_vm1, %v523_v50 }
 0x159   :  { %v505_v51 = vpop.f32.mrf.mxu0  ;;  %v525_v52 = vpop.f32.mrf.mxu1 }
 0x15b   :  { %v508_v53 = vpop.f32.mrf.mxu0  ;;  %v528_v54 = vpop.f32.mrf.mxu1 }
 0x15c   :  { %552 = vst.msk [vmem:[#allocation7 + $0x98] sm:$0xff] %vm536_vm1, %v508_v53  ;;  %572 = vst.msk [vmem:[#allocation7 + $0x138] sm:$0xff] %vm536_vm1, %v528_v54 }
 0x15d   :  { %v510_v55 = vpop.f32.mrf.mxu0  ;;  %v530_v56 = vpop.f32.mrf.mxu1 }
 0x15e   :  { %722 = shalt.err (!%p719_p0)
}
 0x15f   :  { %584 = dma.vmem_to_hbm [thread:$0]  %s579_s1, 5120, %s912_s2, [#allocation4], %s741_s19, %s741_s19, %s742_s20  }
 0x160   :  { %735 = dma.done.wait [#allocation4], 5120  }
 0x161   :  { %736 = vsyncadd [#allocation4], 4294962176 }
 0x162   :  { %588 = vsyncpa [#allocation3], 1 }
 0x163   :  { %589 = vsyncpa [#allocation6], 1 }
 0x164   :  { %590 = vsyncpa [#allocation4], 1 }

</bundles_post_ra>
